<compile_context>
chip_gen: v7x
topology: tpu7x:2x2x1
jax: 0.10.0
libtpu: 0.0.40
codegen_flags: <defaults>
</compile_context>

<pallas_src>
import functools

import jax
import jax.numpy as jnp
from jax.experimental import pallas as pl
from jax.experimental.pallas import tpu as pltpu

_LAYERS = ("conv1", "conv2", "conv3", "conv4",
           "conv5", "conv6", "conv7", "conv8")


@functools.lru_cache(maxsize=None)
def _roll_is_numpy_style():
    """True if pltpu.roll matches np.roll (out[i] = x[(i - shift) % n])."""
    def probe(x_ref, o_ref):
        o_ref[...] = pltpu.roll(x_ref[...], 1, axis=1)

    x = jax.lax.broadcasted_iota(jnp.float32, (8, 128), 1)
    y = pl.pallas_call(
        probe, out_shape=jax.ShapeDtypeStruct((8, 128), jnp.float32))(x)
    return bool(y[0, 0] == 127.0)


def _layer_taps(k, dil, pad, H, W, m_blk, np_roll):
    """Static tap metadata with trace-time pruning.

    Returns (tap_ids, taps):
      tap_ids : kept (dy*k+dx) positions, for packing the weight matrix.
      taps    : per kept tap (roll_shift, ylo, yhi, xlo, xhi) where rolling the
                flattened (C, M) activation by roll_shift puts input flat index
                r + s into lane r (s = (dy*dil-pad)*W + (dx*dil-pad)), and the
                [ylo,yhi)x[xlo,xhi) output range marks the lanes that read a
                real (non-padding) pixel; everything else is masked to zero,
                which also kills any cross-image wraparound of the roll.
    """
    tap_ids, taps = [], []
    for dy in range(k):
        offy = dy * dil - pad
        ylo, yhi = max(0, -offy), min(H, H - offy)
        if ylo >= yhi:                       # row shift entirely in padding
            continue
        for dx in range(k):
            offx = dx * dil - pad
            xlo, xhi = max(0, -offx), min(W, W - offx)
            if xlo >= xhi:                   # column shift entirely in padding
                continue
            s = offy * W + offx
            shift = (-s) % m_blk if np_roll else s % m_blk
            tap_ids.append(dy * k + dx)
            taps.append((shift, ylo, yhi, xlo, xhi))
    return tuple(tap_ids), tuple(taps)


def _dg_fused_kernel(*refs, H, W, m_blk, layer_taps):
    """Fully fused DG forward for one stacked batch block.

    refs = (x, w1, b1, ..., w8, b8, out, col)
      x   : (cin_pad, m_blk) f32   channels-major flattened input block
      w_i : (cout_i, n_taps_i*cin_i) bf16 packed (pruned-tap) weights
      b_i : (cout_i, 1) f32
      out : (2, m_blk) f32
      col : (K_max, m_blk) bf16 VMEM im2col scratch shared by all layers
    """
    n_layers = len(layer_taps)
    x_ref = refs[0]
    w_refs = [refs[1 + 2 * i] for i in range(n_layers)]
    b_refs = [refs[2 + 2 * i] for i in range(n_layers)]
    o_ref = refs[1 + 2 * n_layers]
    col_ref = refs[2 + 2 * n_layers]

    HW = H * W
    cache = {}   # trace-time cache: coordinate rows + deduped border masks

    def border_mask(ylo, yhi, xlo, xhi):
        if (ylo, yhi, xlo, xhi) == (0, H, 0, W):
            return None                           # tap never touches padding
        if "y" not in cache:
            flat = jax.lax.broadcasted_iota(jnp.int32, (1, m_blk), 1)
            cache["y"] = (flat % HW) // W         # y within each image
            cache["x"] = flat % W                 # x within each row
        key = (ylo, yhi, xlo, xhi)
        if key not in cache:
            conds = []
            if ylo > 0:
                conds.append(cache["y"] >= ylo)
            if yhi < H:
                conds.append(cache["y"] < yhi)
            if xlo > 0:
                conds.append(cache["x"] >= xlo)
            if xhi < W:
                conds.append(cache["x"] < xhi)
            m = conds[0]
            for c in conds[1:]:
                m = m & c
            cache[key] = m
        return cache[key]

    def tap_value(src, shift, ylo, yhi, xlo, xhi):
        # Lane roll on the XLU (free slot) + precomputed border mask.
        v = src if shift == 0 else pltpu.roll(src, shift, axis=1)
        m = border_mask(ylo, yhi, xlo, xhi)
        return v if m is None else jnp.where(m, v, jnp.zeros_like(v))

    def conv_relu(src, w_ref, b_ref, taps):
        # src: (cin, m_blk) bf16 value  ->  (cout, m_blk) f32 value.
        cin = src.shape[0]
        if len(taps) == 1:
            col = tap_value(src, *taps[0])        # e.g. conv6: im2col == src
        else:
            for t, tap in enumerate(taps):        # build im2col in VMEM
                col_ref[t * cin:(t + 1) * cin, :] = tap_value(src, *tap)
            col = col_ref[0:len(taps) * cin, :]
        # One big-K MXU matmul per layer; accumulation happens inside the MXU.
        acc = jnp.dot(w_ref[...], col, preferred_element_type=jnp.float32)
        return jnp.maximum(acc + b_ref[...], 0.0)   # fused bias + ReLU

    act = x_ref[...].astype(jnp.bfloat16)           # activations stay in vregs
    for li in range(n_layers):
        out = conv_relu(act, w_refs[li], b_refs[li], layer_taps[li])
        if li + 1 == n_layers:
            o_ref[...] = out                        # single f32 output store
        else:
            act = out.astype(jnp.bfloat16)


def dg_forward(x_nchw, params):
    """Equivalent of DG.forward: 8x (conv + ReLU); returns (N, H, W, 2) f32."""
    N, cin0, H, W = x_nchw.shape
    HW = H * W

    # Batch blocking: two parallel grid blocks when possible (feeds both v7x
    # TensorCores); otherwise everything stacked into a single block so
    # single-TC v5e/v6e see (almost) no grid-step overhead.
    n_blocks = 2 if (N >= 2 and N % 2 == 0) else 1
    m_blk = (N // n_blocks) * HW

    np_roll = _roll_is_numpy_style()

    # Input: NCHW -> channels-major flattened (C, N*H*W); channels padded to a
    # multiple of 16 so bf16 im2col block stores stay tile-aligned.
    cin_pad = ((cin0 + 15) // 16) * 16
    x = jnp.transpose(x_nchw, (1, 0, 2, 3)).reshape(cin0, N * HW)
    x = jnp.pad(x.astype(jnp.float32), ((0, cin_pad - cin0), (0, 0)))

    args = [x]
    in_specs = [pl.BlockSpec((cin_pad, m_blk), lambda n: (0, n))]
    layer_taps = []
    k_max = 16
    for li, name in enumerate(_LAYERS):
        cfg = params[name]
        w = jnp.asarray(cfg["w"], jnp.float32)
        cout, ci, k, _ = w.shape
        if li == 0:                                  # pad conv1 input channels
            w = jnp.pad(w, ((0, 0), (0, cin_pad - ci), (0, 0), (0, 0)))
            ci = cin_pad
        tap_ids, taps = _layer_taps(k, cfg["dilation"], cfg["padding"],
                                    H, W, m_blk, np_roll)
        # (Cout, Cin, kh, kw) -> packed (Cout, n_taps*Cin), pruned taps dropped.
        w_packed = jnp.transpose(w, (0, 2, 3, 1)).reshape(cout, k * k, ci)
        w_packed = jnp.take(w_packed, jnp.array(tap_ids), axis=1)
        w_packed = w_packed.reshape(cout, len(taps) * ci)
        args.append(w_packed.astype(jnp.bfloat16))
        args.append(jnp.asarray(cfg["b"], jnp.float32).reshape(cout, 1))
        # Constant index_maps: the pipeline keeps weights resident across steps.
        in_specs.append(pl.BlockSpec(tuple(w_packed.shape), lambda n: (0, 0)))
        in_specs.append(pl.BlockSpec((cout, 1), lambda n: (0, 0)))
        layer_taps.append(taps)
        k_max = max(k_max, len(taps) * ci)

    c8 = params[_LAYERS[-1]]["w"].shape[0]
    kernel = functools.partial(_dg_fused_kernel, H=H, W=W, m_blk=m_blk,
                               layer_taps=tuple(layer_taps))
    out = pl.pallas_call(
        kernel,
        out_shape=jax.ShapeDtypeStruct((c8, N * HW), jnp.float32),
        grid=(n_blocks,),
        in_specs=in_specs,
        out_specs=pl.BlockSpec((c8, m_blk), lambda n: (0, n)),
        scratch_shapes=[pltpu.VMEM((k_max, m_blk), jnp.bfloat16)],  # im2col
        compiler_params=pltpu.CompilerParams(
            dimension_semantics=("parallel",)),
    )(*args)
    # (2, N*H*W) -> (N, H, W, 2)  ==  PyTorch's out.permute(0, 2, 3, 1).
    return jnp.transpose(out.reshape(c8, N, H, W), (1, 2, 3, 0))


def dg_reference(x, params):
    """Pure-JAX f32 reference of DG.forward (for validation only)."""
    out = x.astype(jnp.float32)
    for name in _LAYERS:
        cfg = params[name]
        pad, dil = cfg["padding"], cfg["dilation"]
        out = jax.lax.conv_general_dilated(
            out, jnp.asarray(cfg["w"], jnp.float32), window_strides=(1, 1),
            padding=[(pad, pad), (pad, pad)], rhs_dilation=(dil, dil),
            dimension_numbers=("NCHW", "OIHW", "NCHW"),
            precision=jax.lax.Precision.HIGHEST)
        out = jnp.maximum(out + jnp.asarray(cfg["b"]).reshape(1, -1, 1, 1), 0.0)
    return jnp.transpose(out, (0, 2, 3, 1))


def init_dg_params(key, k=5, t=1):
    """Deterministic synthetic parameters mirroring DG.__init__ shapes."""
    p = (k - 1) // 2
    d = (k + 1) // 2
    fm = 32 * (t + 1)
    cin = t + 1
    assert fm % cin == 0, "grouped conv1 requires fm % (t+1) == 0"
    keys = jax.random.split(key, 16)
    params = {}

    # conv1: Conv2d(t+1, fm, k, padding=p, groups=t+1) -> equivalent dense weight.
    per_group = fm // cin
    wg = jax.random.normal(keys[0], (fm, 1, k, k), dtype=jnp.float32) * 0.05
    w1 = jnp.zeros((fm, cin, k, k), dtype=jnp.float32)
    for g in range(cin):
        w1 = w1.at[g * per_group:(g + 1) * per_group, g, :, :].set(
            wg[g * per_group:(g + 1) * per_group, 0])
    params["conv1"] = dict(w=w1, b=jax.random.normal(keys[1], (fm,)) * 0.05,
                           dilation=1, padding=p)

    # conv2: Conv2d(fm, fm, k, padding=p)
    params["conv2"] = dict(w=jax.random.normal(keys[2], (fm, fm, k, k)) * 0.02,
                           b=jax.random.normal(keys[3], (fm,)) * 0.02,
                           dilation=1, padding=p)

    # conv3..conv6: DConv — N(0, 0.01) with identity at the centre tap.
    for i, dil in enumerate([d, 2 * d, 4 * d, 8 * d]):
        w = jax.random.normal(keys[4 + 2 * i], (fm, fm, k, k)) * 0.01
        idx = jnp.arange(fm)
        w = w.at[idx, idx, k // 2, k // 2].set(1.0)
        params["conv%d" % (3 + i)] = dict(
            w=w, b=jax.random.normal(keys[5 + 2 * i], (fm,)) * 0.005,
            dilation=dil, padding=p * dil)

    # conv7: Conv2d(fm, 16, 3, padding=1); conv8: Conv2d(16, 2, 3, padding=1).
    params["conv7"] = dict(w=jax.random.normal(keys[12], (16, fm, 3, 3)) * 0.05,
                           b=jax.random.normal(keys[13], (16,)) * 0.02,
                           dilation=1, padding=1)
    params["conv8"] = dict(w=jax.random.normal(keys[14], (2, 16, 3, 3)) * 0.02,
                           b=jax.random.normal(keys[15], (2,)) * 0.02,
                           dilation=1, padding=1)
    return params


if __name__ == "__main__":
    key = jax.random.PRNGKey(0)
    kx, kp = jax.random.split(key)

    N, t, H, W = 2, 1, 16, 16            # DG input channels = t + 1
    x = jax.random.normal(kx, (N, t + 1, H, W), dtype=jnp.float32)
    params = init_dg_params(kp, k=5, t=t)

    out = jax.block_until_ready(dg_forward(x, params))
    assert out.shape == (N, H, W, 2), out.shape
    assert out.dtype == jnp.float32
    assert bool(jnp.all(out >= 0.0))     # DG ReLUs the conv8 output too

    # Validate against a pure-JAX f32 reference (kernel uses bf16 on the MXU,
    # so the tolerance is loose but still catches structural errors).
    ref = jax.block_until_ready(dg_reference(x, params))
    err = float(jnp.max(jnp.abs(out - ref)))
    scale = float(jnp.max(jnp.abs(ref)))
    assert err <= 5e-2 * scale + 5e-3, (err, scale)

    print("KERNEL_OK")
</pallas_src>

<mosaic_0001>
module attributes {stable_mosaic.version = 11 : i64} {
  func.func @probe(%arg0: memref<8x128xf32, #tpu.memory_space<vmem>>, %arg1: memref<8x128xf32, #tpu.memory_space<vmem>>) attributes {dimension_semantics = [], scalar_prefetch = 0 : i64, scratch_operands = 0 : i64, tpu.core_type = #tpu.core_type<tc>} {
    %c0 = arith.constant 0 : index
    %c0_0 = arith.constant 0 : index
    %0 = vector.load %arg0[%c0, %c0_0] : memref<8x128xf32, #tpu.memory_space<vmem>>, vector<8x128xf32>
    %c1_i32 = arith.constant 1 : i32
    %1 = tpu.dynamic_rotate %0 by %c1_i32 dim 1 : vector<8x128xf32>, i32 -> vector<8x128xf32>
    %c0_1 = arith.constant 0 : index
    %c0_2 = arith.constant 0 : index
    %2 = vector.load %arg1[%c0_1, %c0_2] : memref<8x128xf32, #tpu.memory_space<vmem>>, vector<8x128xf32>
    tpu.vector_store %arg1[%c0_1, %c0_2], %1 {strides = array<i32>} : memref<8x128xf32, #tpu.memory_space<vmem>>, vector<8x128xf32>,
    return
  }
}

</mosaic_0001>

<bundles_post_ra>
// kernel: tpu_custom_call.1
= control target key start
LH: loop header
LB: loop body
LE: loop exit
PB: predicated region body
PF: predicated region fallthrough
CT: control target
= control target key end

     0   :  { %6 = vsyncpa [#allocation3], 0  ;;  %s128_s0 = inlined_call_operand.hbm [shape: f32[8,128], index: 0, kind: input, shape index: {}]   ;;  %s129_s1 = inlined_call_operand.hbm [shape: f32[8,128], index: 1, kind: output, shape index: {}]  }
   0x1   :  { %7 = vsyncpa [#allocation4], 0  ;;  %s91_s6 = smov [#allocation2]   ;;  %s43_s10 = scalar_lea.hbm %s128_s0, 128 }
   0x2   :  { %s14_s7 = sshll.u32 %s91_s6, 4  ;;  %p44_p0 = scmp.ne.s32.totalorder %s128_s0, %s43_s10  ;;  %s15_s7 = int_to_ptr.vmem [resolvable:$true] %s14_s7 }
   0x3   :  { %p47_p1 = scmp.lt.u32.totalorder %s43_s10, %s128_s0 }
   0x5   :  { %p49_p2 = pnand %p47_p1, %p44_p0 }
   0x7   :  { %52 = shalt.err (!%p49_p2)
}
   0x8   :  { %s53_s15 = scalar_lea.vmem %s15_s7, 128  ;;  %p58_p4 = scmp.lt.s32.totalorder %s15_s7, %s15_s7 }
   0x9   :  { %p54_p3 = scmp.ne.s32.totalorder %s15_s7, %s53_s15  ;;  %p59_p5 = scmp.lt.s32.totalorder %s53_s15, %s53_s15 }
   0xb   :  { %p60_p6 = por %p59_p5, %p58_p4 }
   0xd   :  { %p61_p7 = pnand %p60_p6, %p54_p3 }
   0xf   :  { %64 = shalt.err (!%p61_p7)
}
  0x10   :  { %17 = dma.hbm_to_vmem [thread:$0]  %s128_s0, 128, %s15_s7, [#allocation3]  }
  0x11   :  { %87 = dma.done.wait [#allocation3], 128  }
  0x12   :  { %88 = vsyncadd [#allocation3], 4294967168  ;;  %v21_v0 = vld [vmem:[#allocation2] sm:$0xff]  ;;  %s92_s18 = smov 1   ;;  %s93_s19 = smov [#allocation5]  }
  0x13   :  { %22 = vrot.lane.b32.xlu0 %v21_v0, %s92_s18  ;;  %s31_s20 = sshll.u32 %s93_s19, 4  ;;  %s32_s20 = int_to_ptr.vmem [resolvable:$true] %s31_s20 }
  0x14   :  { %s65_s21 = scalar_lea.vmem %s32_s20, 128  ;;  %p70_p9 = scmp.lt.s32.totalorder %s32_s20, %s32_s20 }
  0x15   :  { %p66_p8 = scmp.ne.s32.totalorder %s32_s20, %s65_s21  ;;  %p71_p10 = scmp.lt.s32.totalorder %s65_s21, %s65_s21 }
  0x17   :  { %p72_p11 = por %p71_p10, %p70_p9 }
  0x19   :  { %p73_p12 = pnand %p72_p11, %p66_p8 }
  0x85   :  { %v23_v1 = vpop.permute.xlu0 %22 }
  0x86   :  { %24 = vst [vmem:[#allocation5] sm:$0xff] %v23_v1 }
  0x87   :  { %76 = shalt.err (!%p73_p12)
}
  0x88   :  { %s77_s0 = scalar_lea.hbm %s129_s1, 128 }
  0x89   :  { %p78_p13 = scmp.ne.s32.totalorder %s129_s1, %s77_s0  ;;  %p81_p0 = scmp.lt.u32.totalorder %s77_s0, %s129_s1 }
  0x8b   :  { %p83_p1 = pnand %p81_p0, %p78_p13 }
  0x8d   :  { %86 = shalt.err (!%p83_p1)
}
  0x8e   :  { %34 = dma.vmem_to_hbm [thread:$0]  %s32_s20, 128, %s129_s1, [#allocation4]  }
  0x8f   :  { %89 = dma.done.wait [#allocation4], 128  }
  0x90   :  { %90 = vsyncadd [#allocation4], 4294967168 }
  0x91   :  { %38 = vsyncpa [#allocation3], 1 }
  0x92   :  { %39 = vsyncpa [#allocation4], 1 }

</bundles_post_ra>
